<compile_context>
chip_gen: v6e
topology: v6e:2x2x1
jax: 0.10.0
libtpu: 0.0.40
codegen_flags: <defaults>
</compile_context>

<pallas_src>
import functools

import jax
import jax.numpy as jnp
from jax import lax
from jax.experimental import pallas as pl
from jax.experimental.pallas import tpu as pltpu


def _vmem_capacity_bytes():
    try:
        return int(pltpu.get_tpu_info().vmem_capacity_bytes)
    except Exception:
        return 128 * 2**20  # v5e/v6e physical VMEM; conservative default


# --------------------- main path: resident channel block ---------------------


def _ssn_kernel(x_ref, gb_ref, o_ref, *, n_rows, cblk, eps, inv_n, n_pad):
    """One channel-block of sub-band BatchNorm.

    x_ref/o_ref blocks: (N, cblk, M_pad).  gb_ref: (CS_pad, 2) VMEM-resident
    [gamma | beta].  Stats and apply loop over batch rows so only one
    (cblk, M_pad) f32 slab is live at a time (no whole-block temporaries).
    """
    unroll = n_rows <= 8
    off = pl.multiple_of(pl.program_id(0) * cblk, 8)
    g = gb_ref[pl.ds(off, cblk), 0:1].astype(jnp.float32)    # (cblk, 1)
    b0 = gb_ref[pl.ds(off, cblk), 1:2].astype(jnp.float32)   # (cblk, 1)

    # Pass 1: per-channel sum (zero-padded lane columns contribute nothing).
    def _mean_body(n, s1):
        xf = x_ref[n].astype(jnp.float32)                    # (cblk, M_pad)
        return s1 + jnp.sum(xf, axis=1, keepdims=True)

    s1 = lax.fori_loop(0, n_rows, _mean_body,
                       jnp.zeros((cblk, 1), jnp.float32), unroll=unroll)
    mean = s1 * inv_n

    # Pass 2: centered sum of squares (two-pass variance: no cancellation).
    def _var_body(n, s2):
        d = x_ref[n].astype(jnp.float32) - mean
        return s2 + jnp.sum(d * d, axis=1, keepdims=True)

    s2 = lax.fori_loop(0, n_rows, _var_body,
                       jnp.zeros((cblk, 1), jnp.float32), unroll=unroll)
    if n_pad:
        # Each zero pad column contributed mean^2 to the centered SS; subtract
        # the exact pad contribution before normalizing by the real count.
        s2 = s2 - n_pad * mean * mean
    var = jnp.maximum(s2 * inv_n, 0.0)                        # biased variance

    a = g * lax.rsqrt(var + eps)                              # per-chan scale
    b = b0 - mean * a                                         # per-chan shift

    # Pass 3: fused apply; f32 compute, cast only at the store.
    @pl.loop(0, n_rows, unroll=unroll)
    def _apply(n):
        xf = x_ref[n].astype(jnp.float32)
        o_ref[n] = (xf * a + b).astype(o_ref.dtype)


def _choose_cblk_main(CS, per_chan_bytes, budget_bytes):
    """Largest multiple-of-8 channel block fitting the VMEM budget, capped so
    the grid keeps >=2 (CS>=16) / >=4 (CS>=32) steps (megacore + pipelining).
    Returns 0 if even the smallest legal block overflows (-> two-pass path)."""
    if CS <= 8:
        # Cannot split below 8 sublanes: single full block or fallback.
        return CS if CS * per_chan_bytes <= budget_bytes else 0
    fit = (budget_bytes // per_chan_bytes) // 8 * 8
    if fit < 8:
        return 0
    if CS >= 32:
        min_steps = 4
    elif CS >= 16:
        min_steps = 2
    else:
        min_steps = 1
    par_cap = max(8, ((CS // min_steps) // 8) * 8)
    cs_cap = ((CS + 7) // 8) * 8
    return min(fit, par_cap, cs_cap)


# --------------------- fallback path: two-pass over HBM ----------------------


def _ssn_stats_kernel(x_ref, s1_ref, s2_ref):
    # Accumulate per-channel sum / sum-of-squares across the batch-row axis.
    @pl.when(pl.program_id(1) == 0)
    def _():
        s1_ref[...] = jnp.zeros_like(s1_ref)
        s2_ref[...] = jnp.zeros_like(s2_ref)

    xf = x_ref[0].astype(jnp.float32)                          # (cblk, M_pad)
    s1_ref[...] += jnp.sum(xf, axis=1, keepdims=True)
    s2_ref[...] += jnp.sum(xf * xf, axis=1, keepdims=True)


def _ssn_apply_kernel(x_ref, a_ref, b_ref, o_ref):
    xf = x_ref[0].astype(jnp.float32)
    o_ref[0] = (xf * a_ref[...] + b_ref[...]).astype(o_ref.dtype)


def _ssn_two_pass(x2, gamma, beta, N, CS, M, M_pad, eps, inv_n, itemsize,
                  budget, limit_cap):
    """Fallback when one (N, 8, M) block overflows VMEM (earliest on v7x's
    64 MiB/TC): stats accumulated over a batch-row grid axis into a resident
    per-channel output, then an elementwise apply pass.  x is read twice from
    HBM but never held whole in VMEM."""
    per_chan = M_pad * itemsize * 4 + M_pad * 8   # dbl-buffered (1,cblk,M) in+out
    if CS <= 8:
        cblk = CS
    else:
        cblk = max(8, min(((CS + 7) // 8) * 8, (budget // per_chan) // 8 * 8))
    # TODO(synk): if even a (1, 8, M_pad) block overflows VMEM, M would also
    # need tiling; not expected for realistic audio shapes.
    grid_c = pl.cdiv(CS, cblk)
    CS_pad = grid_c * cblk

    vmem_needed = cblk * per_chan + (2 << 20)
    vmem_limit = int(min(limit_cap, max(32 * 2**20, vmem_needed)))

    s1, s2 = pl.pallas_call(
        _ssn_stats_kernel,
        out_shape=(jax.ShapeDtypeStruct((CS_pad, 1), jnp.float32),
                   jax.ShapeDtypeStruct((CS_pad, 1), jnp.float32)),
        grid_spec=pltpu.PrefetchScalarGridSpec(
            num_scalar_prefetch=0,
            grid=(grid_c, N),
            in_specs=[pl.BlockSpec((1, cblk, M_pad), lambda c, n: (n, c, 0))],
            out_specs=(pl.BlockSpec((cblk, 1), lambda c, n: (c, 0)),
                       pl.BlockSpec((cblk, 1), lambda c, n: (c, 0))),
        ),
        compiler_params=pltpu.CompilerParams(
            dimension_semantics=("parallel", "arbitrary"),
            vmem_limit_bytes=vmem_limit),
    )(x2)

    # Tiny per-channel affine terms in plain XLA (zero pad columns contribute
    # nothing to the uncentered sums; inv_n uses the real element count).
    mean = s1[:CS] * inv_n
    var = jnp.maximum(s2[:CS] * inv_n - mean * mean, 0.0)
    a = gamma.astype(jnp.float32).reshape(CS, 1) * lax.rsqrt(var + eps)
    b = beta.astype(jnp.float32).reshape(CS, 1) - mean * a
    if CS_pad != CS:
        a = jnp.pad(a, ((0, CS_pad - CS), (0, 0)))
        b = jnp.pad(b, ((0, CS_pad - CS), (0, 0)))

    out = pl.pallas_call(
        _ssn_apply_kernel,
        out_shape=jax.ShapeDtypeStruct(x2.shape, x2.dtype),
        grid_spec=pltpu.PrefetchScalarGridSpec(
            num_scalar_prefetch=0,
            grid=(grid_c, N),
            in_specs=[pl.BlockSpec((1, cblk, M_pad), lambda c, n: (n, c, 0)),
                      pl.BlockSpec((cblk, 1), lambda c, n: (c, 0)),
                      pl.BlockSpec((cblk, 1), lambda c, n: (c, 0))],
            out_specs=pl.BlockSpec((1, cblk, M_pad), lambda c, n: (n, c, 0)),
        ),
        compiler_params=pltpu.CompilerParams(
            dimension_semantics=("parallel", "parallel"),
            vmem_limit_bytes=vmem_limit),
    )(x2, a, b)
    return out


# ------------------------------- public wrapper -------------------------------


def sub_spectral_norm(x, gamma, beta, S, eps=1e-5, force_two_pass=False):
    """x: (N, C, F, T). gamma, beta: (C*S,). Training-mode BatchNorm2d(C*S)."""
    N, C, F, T = x.shape
    assert F % S == 0, "F must be divisible by S"
    Fs = F // S
    CS = C * S
    M = Fs * T

    # Glue: torch .view(N, C*S, F//S, T), then merge trailing dims so the lane
    # dim is Fs*T. Both are free row-major reinterpretations (no transpose).
    x2 = x.reshape(N, CS, M)

    # Lane-dense padding of the merged trailing dim (unmasked vector stores).
    M_pad = ((M + 127) // 128) * 128
    if M_pad != M:
        # TODO(synk): for small lane waste the masked-store cost may beat the
        # extra pad/slice HBM copies; this keeps the simple lane-dense choice.
        x2 = jnp.pad(x2, ((0, 0), (0, 0), (0, M_pad - M)))

    inv_n = 1.0 / float(N * M)
    itemsize = jnp.dtype(x.dtype).itemsize

    # Chip-aware VMEM sizing: ~80 MiB budget / 96 MiB limit on 128 MiB parts
    # (v5e/v6e), ~40 / 48 MiB on v7x's 64 MiB per-TC VMEM.
    vmem_cap = _vmem_capacity_bytes()
    budget = (vmem_cap * 5) // 8
    limit_cap = (vmem_cap * 3) // 4

    # Per channel: double-buffered input + output blocks plus a few f32 row
    # slabs of loop working set (no whole-block f32 temporaries anymore).
    per_chan_bytes = N * M_pad * itemsize * 4 + M_pad * 12

    cblk = 0 if force_two_pass else _choose_cblk_main(CS, per_chan_bytes, budget)

    if cblk > 0:
        grid_c = pl.cdiv(CS, cblk)
        CS_pad = grid_c * cblk

        # gamma/beta combined and padded so the in-kernel dynamic sublane
        # slice never leaves the allocation; DMA'd once (constant index_map).
        gb = jnp.stack([gamma.astype(jnp.float32),
                        beta.astype(jnp.float32)], axis=-1)   # (CS, 2)
        if CS_pad != CS:
            gb = jnp.pad(gb, ((0, CS_pad - CS), (0, 0)))

        vmem_needed = cblk * per_chan_bytes + CS_pad * 1024 + (2 << 20)
        vmem_limit = int(min(limit_cap, max(32 * 2**20, vmem_needed)))

        kernel = functools.partial(
            _ssn_kernel, n_rows=N, cblk=cblk, eps=float(eps), inv_n=inv_n,
            n_pad=float(N * (M_pad - M)))

        out = pl.pallas_call(
            kernel,
            out_shape=jax.ShapeDtypeStruct((N, CS, M_pad), x.dtype),
            grid_spec=pltpu.PrefetchScalarGridSpec(
                num_scalar_prefetch=0,
                grid=(grid_c,),
                in_specs=[
                    pl.BlockSpec((N, cblk, M_pad), lambda c: (0, c, 0)),
                    # gamma/beta stay VMEM-resident across all grid steps.
                    pl.BlockSpec((CS_pad, 2), lambda c: (0, 0)),
                ],
                out_specs=pl.BlockSpec((N, cblk, M_pad), lambda c: (0, c, 0)),
            ),
            compiler_params=pltpu.CompilerParams(
                dimension_semantics=("parallel",),
                vmem_limit_bytes=vmem_limit,
            ),
        )(x2, gb)
    else:
        out = _ssn_two_pass(x2, gamma, beta, N, CS, M, M_pad, float(eps),
                            inv_n, itemsize, budget, limit_cap)

    if M_pad != M:
        out = out[:, :, :M]
    return out.reshape(N, C, F, T)


# ---------------------------------- testing ----------------------------------


def _reference(x, gamma, beta, S, eps=1e-5):
    N, C, F, T = x.shape
    xr = x.reshape(N, C * S, F // S, T).astype(jnp.float32)
    mean = xr.mean(axis=(0, 2, 3), keepdims=True)
    var = ((xr - mean) ** 2).mean(axis=(0, 2, 3), keepdims=True)
    y = (xr - mean) / jnp.sqrt(var + eps)
    y = y * gamma[None, :, None, None] + beta[None, :, None, None]
    return y.reshape(N, C, F, T).astype(x.dtype)


if __name__ == "__main__":
    key = jax.random.PRNGKey(0)
    N, C, F, T = 2, 4, 16, 16
    S = 2
    CS = C * S

    x = jax.random.normal(key, (N, C, F, T), dtype=jnp.float32)

    # nn.BatchNorm2d.__init__ parameter init: weight=1, bias=0.
    gamma = jnp.ones((CS,), dtype=jnp.float32)
    beta = jnp.zeros((CS,), dtype=jnp.float32)

    y_ref = _reference(x, gamma, beta, S)

    # Main (resident channel-block) path.
    y = jax.block_until_ready(sub_spectral_norm(x, gamma, beta, S))
    assert jnp.allclose(y, y_ref, atol=1e-4, rtol=1e-4), "main path mismatch"

    # Large-tensor two-pass fallback path, forced so it stays exercised.
    y2 = jax.block_until_ready(
        sub_spectral_norm(x, gamma, beta, S, force_two_pass=True))
    assert jnp.allclose(y2, y_ref, atol=1e-4, rtol=1e-4), "fallback mismatch"

    print("KERNEL_OK")
</pallas_src>

<mosaic_0001>
module attributes {stable_mosaic.version = 11 : i64} {
  func.func @_ssn_kernel(%arg0: i32, %arg1: memref<2x8x128xf32, #tpu.memory_space<vmem>>, %arg2: memref<8x2xf32, #tpu.memory_space<vmem>>, %arg3: memref<2x8x128xf32, #tpu.memory_space<vmem>>) attributes {dimension_semantics = [#tpu.dimension_semantics<parallel>], iteration_bounds = array<i64: 1>, scalar_prefetch = 0 : i64, scratch_operands = 0 : i64, tpu.core_type = #tpu.core_type<tc>, window_params = [{transform_indices = @transform_0, window_bounds = array<i64: 2, 8, 128>}, {pipeline_mode = #tpu.pipeline_mode<synchronous>, transform_indices = @transform_1, window_bounds = array<i64: 8, 2>}, {transform_indices = @transform_2, window_bounds = array<i64: 2, 8, 128>}]} {
    %c8_i32 = arith.constant 8 : i32
    %0 = arith.muli %arg0, %c8_i32 : i32
    %1 = tpu.assume_multiple %0, 8 : i32
    %2 = arith.index_cast %1 : i32 to index
    %c0 = arith.constant 0 : index
    %3 = vector.load %arg2[%2, %c0] : memref<8x2xf32, #tpu.memory_space<vmem>>, vector<8x1xf32>
    %4 = arith.index_cast %1 : i32 to index
    %c1 = arith.constant 1 : index
    %5 = vector.load %arg2[%4, %c1] : memref<8x2xf32, #tpu.memory_space<vmem>>, vector<8x1xf32>
    %cst = arith.constant 0.000000e+00 : f32
    %6 = vector.broadcast %cst : f32 to vector<8x1xf32>
    %c0_i32 = arith.constant 0 : i32
    %7 = arith.index_cast %c0_i32 : i32 to index
    %c0_0 = arith.constant 0 : index
    %c0_1 = arith.constant 0 : index
    %8 = vector.load %arg1[%7, %c0_0, %c0_1] : memref<2x8x128xf32, #tpu.memory_space<vmem>>, vector<1x8x128xf32>
    %9 = vector.shape_cast %8 : vector<1x8x128xf32> to vector<8x128xf32>
    %cst_2 = arith.constant dense<0.000000e+00> : vector<8xf32>
    %10 = vector.multi_reduction <add>, %9, %cst_2 [1] : vector<8x128xf32> to vector<8xf32>
    %11 = vector.shape_cast %10 : vector<8xf32> to vector<8x1xf32>
    %12 = arith.addf %6, %11 : vector<8x1xf32>
    %c1_i32 = arith.constant 1 : i32
    %13 = arith.index_cast %c1_i32 : i32 to index
    %c0_3 = arith.constant 0 : index
    %c0_4 = arith.constant 0 : index
    %14 = vector.load %arg1[%13, %c0_3, %c0_4] : memref<2x8x128xf32, #tpu.memory_space<vmem>>, vector<1x8x128xf32>
    %15 = vector.shape_cast %14 : vector<1x8x128xf32> to vector<8x128xf32>
    %cst_5 = arith.constant dense<0.000000e+00> : vector<8xf32>
    %16 = vector.multi_reduction <add>, %15, %cst_5 [1] : vector<8x128xf32> to vector<8xf32>
    %17 = vector.shape_cast %16 : vector<8xf32> to vector<8x1xf32>
    %18 = arith.addf %12, %17 : vector<8x1xf32>
    %c2_i32 = arith.constant 2 : i32
    %cst_6 = arith.constant 3.906250e-03 : f32
    %19 = vector.broadcast %cst_6 : f32 to vector<8x1xf32>
    %20 = arith.mulf %18, %19 : vector<8x1xf32>
    %cst_7 = arith.constant 0.000000e+00 : f32
    %21 = vector.broadcast %cst_7 : f32 to vector<8x1xf32>
    %c0_i32_8 = arith.constant 0 : i32
    %22 = arith.index_cast %c0_i32_8 : i32 to index
    %c0_9 = arith.constant 0 : index
    %c0_10 = arith.constant 0 : index
    %23 = vector.load %arg1[%22, %c0_9, %c0_10] : memref<2x8x128xf32, #tpu.memory_space<vmem>>, vector<1x8x128xf32>
    %24 = vector.shape_cast %23 : vector<1x8x128xf32> to vector<8x128xf32>
    %25 = vector.broadcast %20 : vector<8x1xf32> to vector<8x128xf32>
    %26 = arith.subf %24, %25 : vector<8x128xf32>
    %27 = arith.mulf %26, %26 : vector<8x128xf32>
    %cst_11 = arith.constant dense<0.000000e+00> : vector<8xf32>
    %28 = vector.multi_reduction <add>, %27, %cst_11 [1] : vector<8x128xf32> to vector<8xf32>
    %29 = vector.shape_cast %28 : vector<8xf32> to vector<8x1xf32>
    %30 = arith.addf %21, %29 : vector<8x1xf32>
    %c1_i32_12 = arith.constant 1 : i32
    %31 = arith.index_cast %c1_i32_12 : i32 to index
    %c0_13 = arith.constant 0 : index
    %c0_14 = arith.constant 0 : index
    %32 = vector.load %arg1[%31, %c0_13, %c0_14] : memref<2x8x128xf32, #tpu.memory_space<vmem>>, vector<1x8x128xf32>
    %33 = vector.shape_cast %32 : vector<1x8x128xf32> to vector<8x128xf32>
    %34 = vector.broadcast %20 : vector<8x1xf32> to vector<8x128xf32>
    %35 = arith.subf %33, %34 : vector<8x128xf32>
    %36 = arith.mulf %35, %35 : vector<8x128xf32>
    %cst_15 = arith.constant dense<0.000000e+00> : vector<8xf32>
    %37 = vector.multi_reduction <add>, %36, %cst_15 [1] : vector<8x128xf32> to vector<8xf32>
    %38 = vector.shape_cast %37 : vector<8xf32> to vector<8x1xf32>
    %39 = arith.addf %30, %38 : vector<8x1xf32>
    %c2_i32_16 = arith.constant 2 : i32
    %cst_17 = arith.constant 3.906250e-03 : f32
    %40 = vector.broadcast %cst_17 : f32 to vector<8x1xf32>
    %41 = arith.mulf %39, %40 : vector<8x1xf32>
    %cst_18 = arith.constant 0.000000e+00 : f32
    %42 = vector.broadcast %cst_18 : f32 to vector<8x1xf32>
    %43 = arith.maximumf %41, %42 : vector<8x1xf32>
    %cst_19 = arith.constant 9.99999974E-6 : f32
    %44 = vector.broadcast %cst_19 : f32 to vector<8x1xf32>
    %45 = arith.addf %43, %44 : vector<8x1xf32>
    %46 = math.rsqrt %45 : vector<8x1xf32>
    %47 = arith.mulf %3, %46 : vector<8x1xf32>
    %48 = arith.mulf %20, %47 : vector<8x1xf32>
    %49 = arith.subf %5, %48 : vector<8x1xf32>
    %c0_i32_20 = arith.constant 0 : i32
    %c1_i32_21 = arith.constant 1 : i32
    %50 = arith.muli %c0_i32_20, %c1_i32_21 : i32
    %c0_i32_22 = arith.constant 0 : i32
    %51 = arith.addi %c0_i32_22, %50 : i32
    %52 = arith.index_cast %51 : i32 to index
    %c0_23 = arith.constant 0 : index
    %c0_24 = arith.constant 0 : index
    %53 = vector.load %arg1[%52, %c0_23, %c0_24] : memref<2x8x128xf32, #tpu.memory_space<vmem>>, vector<1x8x128xf32>
    %54 = vector.shape_cast %53 : vector<1x8x128xf32> to vector<8x128xf32>
    %55 = vector.broadcast %47 : vector<8x1xf32> to vector<8x128xf32>
    %56 = arith.mulf %54, %55 : vector<8x128xf32>
    %57 = vector.broadcast %49 : vector<8x1xf32> to vector<8x128xf32>
    %58 = arith.addf %56, %57 : vector<8x128xf32>
    %59 = arith.index_cast %51 : i32 to index
    %c0_25 = arith.constant 0 : index
    %c0_26 = arith.constant 0 : index
    %60 = vector.load %arg3[%59, %c0_25, %c0_26] : memref<2x8x128xf32, #tpu.memory_space<vmem>>, vector<1x8x128xf32>
    %61 = vector.shape_cast %60 : vector<1x8x128xf32> to vector<8x128xf32>
    %62 = vector.shape_cast %58 : vector<8x128xf32> to vector<1x8x128xf32>
    tpu.vector_store %arg3[%59, %c0_25, %c0_26], %62 {strides = array<i32>} : memref<2x8x128xf32, #tpu.memory_space<vmem>>, vector<1x8x128xf32>,
    %c1_i32_27 = arith.constant 1 : i32
    %c1_i32_28 = arith.constant 1 : i32
    %63 = arith.muli %c1_i32_27, %c1_i32_28 : i32
    %c0_i32_29 = arith.constant 0 : i32
    %64 = arith.addi %c0_i32_29, %63 : i32
    %65 = arith.index_cast %64 : i32 to index
    %c0_30 = arith.constant 0 : index
    %c0_31 = arith.constant 0 : index
    %66 = vector.load %arg1[%65, %c0_30, %c0_31] : memref<2x8x128xf32, #tpu.memory_space<vmem>>, vector<1x8x128xf32>
    %67 = vector.shape_cast %66 : vector<1x8x128xf32> to vector<8x128xf32>
    %68 = vector.broadcast %47 : vector<8x1xf32> to vector<8x128xf32>
    %69 = arith.mulf %67, %68 : vector<8x128xf32>
    %70 = vector.broadcast %49 : vector<8x1xf32> to vector<8x128xf32>
    %71 = arith.addf %69, %70 : vector<8x128xf32>
    %72 = arith.index_cast %64 : i32 to index
    %c0_32 = arith.constant 0 : index
    %c0_33 = arith.constant 0 : index
    %73 = vector.load %arg3[%72, %c0_32, %c0_33] : memref<2x8x128xf32, #tpu.memory_space<vmem>>, vector<1x8x128xf32>
    %74 = vector.shape_cast %73 : vector<1x8x128xf32> to vector<8x128xf32>
    %75 = vector.shape_cast %71 : vector<8x128xf32> to vector<1x8x128xf32>
    tpu.vector_store %arg3[%72, %c0_32, %c0_33], %75 {strides = array<i32>} : memref<2x8x128xf32, #tpu.memory_space<vmem>>, vector<1x8x128xf32>,
    %c2_i32_34 = arith.constant 2 : i32
    return
  }
  func.func @transform_0(%arg0: i32) -> (i32, i32, i32) {
    %c0_i32 = arith.constant 0 : i32
    %c0_i32_0 = arith.constant 0 : i32
    %c0_i32_1 = arith.constant 0 : i32
    return %c0_i32, %arg0, %c0_i32_0 : i32, i32, i32
  }
  func.func @transform_1(%arg0: i32) -> (i32, i32) {
    %c0_i32 = arith.constant 0 : i32
    %c0_i32_0 = arith.constant 0 : i32
    %c0_i32_1 = arith.constant 0 : i32
    return %c0_i32, %c0_i32_0 : i32, i32
  }
  func.func @transform_2(%arg0: i32) -> (i32, i32, i32) {
    %c0_i32 = arith.constant 0 : i32
    %c0_i32_0 = arith.constant 0 : i32
    %c0_i32_1 = arith.constant 0 : i32
    return %c0_i32, %arg0, %c0_i32_0 : i32, i32, i32
  }
}

</mosaic_0001>

<bundles_post_ra>
// kernel: tpu_custom_call.1
= control target key start
LH: loop header
LB: loop body
LE: loop exit
PB: predicated region body
PF: predicated region fallthrough
CT: control target
= control target key end

     0   :  { %7 = vsyncpa [#allocation3], 0  ;;  %s188_s0 = inlined_call_operand.hbm [shape: f32[2,8,128], index: 0, kind: input, shape index: {}]   ;;  %s189_s1 = inlined_call_operand.vmem [shape: f32[8,2], index: 1, kind: input, shape index: {}]   ;;  %s190_s2 = inlined_call_operand.hbm [shape: f32[2,8,128], index: 2, kind: output, shape index: {}]  }
   0x1   :  { %8 = vsyncpa [#allocation4], 0  ;;  %s151_s9 = smov [#allocation2]  }
   0x2   :  { %s14_s10 = sshll.u32 %s151_s9, 4  ;;  %s15_s10 = int_to_ptr.vmem [resolvable:$true] %s14_s10 }
   0x3   :  { %s115_s11 = scalar_lea.vmem %s15_s10, 256  ;;  %p120_p1 = scmp.lt.s32.totalorder %s15_s10, %s15_s10 }
   0x4   :  { %p116_p0 = scmp.ne.s32.totalorder %s15_s10, %s115_s11  ;;  %p121_p2 = scmp.lt.s32.totalorder %s115_s11, %s115_s11 }
   0x6   :  { %p122_p3 = por %p121_p2, %p120_p1 }
   0x8   :  { %p123_p4 = pnand %p122_p3, %p116_p0 }
   0xa   :  { %126 = shalt.err (!%p123_p4)
}
   0xb   :  { %s152_s12 = smov 128   ;;  %s153_s13 = smov 8  }
   0xc   :  { %20 = dma.hbm_to_vmem [thread:$0]  %s188_s0, 256, %s15_s10, [#allocation3], %s152_s12, %s152_s12, %s153_s13  }
   0xd   :  { %147 = dma.done.wait [#allocation3], 256  }
   0xe   :  { %148 = vsyncadd [#allocation3], 4294967040  ;;  %v29_v0 = vld [vmem:[#allocation2] sm:$0xff]  ;;  %v34_v1 = vld [vmem:[#allocation2 + $0x8] sm:$0xff]  ;;  %v154_v10 = vmov 0   ;;  %v155_v17 = vmov 1  }
   0xf   :  { %30 = vadd.xlane.f32.xlu0 %v29_v0  ;;  %102 = vset.pattern.permute.xlu1 %v154_v10  ;;  %v28_v18 = vld [vmem:[%s189_s1] sm:$0xff]  ;;  %s156_s17 = smov 1   ;;  %s157_s18 = smov [#allocation5]  }
  0x10   :  { %104 = vset.pattern.permute.xlu0 %v155_v17  ;;  %s83_s19 = sshll.u32 %s157_s18, 4  ;;  %s84_s19 = int_to_ptr.vmem [resolvable:$true] %s83_s19 }
  0x11   :  { %s127_s1 = scalar_lea.vmem %s84_s19, 256  ;;  %p132_p6 = scmp.lt.s32.totalorder %s84_s19, %s84_s19 }
  0x12   :  { %p128_p5 = scmp.ne.s32.totalorder %s84_s19, %s127_s1  ;;  %p133_p7 = scmp.lt.s32.totalorder %s127_s1, %s127_s1 }
  0x13   :  { %35 = vadd.xlane.f32.xlu0 %v34_v1 }
  0x14   :  { %p134_p8 = por %p133_p7, %p132_p6 }
  0x16   :  { %p135_p9 = pnand %p134_p8, %p128_p5 }
  0x98   :  { %v31_v2 = vpop.xlane.xlu0 %30 }
  0x9c   :  { %v36_v3 = vpop.xlane.xlu0 %35 }
  0x9d   :  { %v37_v4 = vadd.f32 %v36_v3, %v31_v2 }
  0x9f   :  { %v38_v5 = vmul.f32 0.00390625, %v37_v4 }
  0xa1   :  { %v39_v6 = vsub.f32 %v29_v0, %v38_v5  ;;  %v44_v8 = vsub.f32 %v34_v1, %v38_v5 }
  0xa3   :  { %v40_v7 = vmul.f32 %v39_v6, %v39_v6  ;;  %v45_v9 = vmul.f32 %v44_v8, %v44_v8 }
  0xa5   :  { %41 = vadd.xlane.f32.xlu1 %v40_v7 }
  0xa9   :  { %46 = vadd.xlane.f32.xlu1 %v45_v9 }
 0x12e   :  { %v42_v11 = vpop.xlane.xlu1 %41 }
 0x132   :  { %v47_v12 = vpop.xlane.xlu1 %46 }
 0x133   :  { %v48_v13 = vadd.f32 %v47_v12, %v42_v11 }
 0x135   :  { %v49_v14 = vmul.f32 0.00390625, %v48_v13 }
 0x137   :  { %v50_v15 = vmax.f32 %v49_v14, 0.0 }
 0x139   :  { %v51_v16 = vadd.f32 1e-05, %v50_v15 }
 0x13b   :  { %105 = vrsqrt.f32 %v51_v16 }
 0x148   :  { %v106_v19 = vpop.eup %105 }
 0x149   :  { %v53_v20 = vmul.f32 %v106_v19, %v28_v18 }
 0x14b   :  { %62 = vperm.xlu1 %102, %v53_v20   ;;  %v54_v21 = vmul.f32 %v53_v20, %v38_v5 }
 0x14d   :  { %56 = vrot.lane.b32.xlu0 %v54_v21, %s156_s17 }
 0x14f   :  { %103 = vset.pattern.permute.xlu1 %v155_v17 }
 0x1bf   :  { %v57_v22 = vpop.permute.xlu0 %56 }
 0x1c0   :  { %v59_v23 = vsub.f32 %v28_v18, %v57_v22 }
 0x1c2   :  { %68 = vperm.xlu1 %103, %v59_v23  }
 0x1c6   :  { %v63_v24 = vpop.permute.xlu1 %62 }
 0x1c7   :  { %v65_v25 = vmul.f32 %v63_v24, %v29_v0  ;;  %v74_v26 = vmul.f32 %v63_v24, %v34_v1 }
 0x23d   :  { %v69_v27 = vpop.permute.xlu1 %68 }
 0x23e   :  { %v71_v28 = vadd.f32 %v69_v27, %v65_v25  ;;  %v75_v29 = vadd.f32 %v74_v26, %v69_v27 }
 0x240   :  { %72 = vst [vmem:[#allocation5] sm:$0xff] %v71_v28  ;;  %77 = vst [vmem:[#allocation5 + $0x8] sm:$0xff] %v75_v29 }
 0x241   :  { %138 = shalt.err (!%p135_p9)
}
 0x242   :  { %89 = dma.vmem_to_hbm [thread:$0]  %s84_s19, 256, %s190_s2, [#allocation4], %s152_s12, %s152_s12, %s153_s13  }
 0x243   :  { %149 = dma.done.wait [#allocation4], 256  }
 0x244   :  { %150 = vsyncadd [#allocation4], 4294967040 }
 0x245   :  { %93 = vsyncpa [#allocation3], 1 }
 0x246   :  { %94 = vsyncpa [#allocation4], 1 }

</bundles_post_ra>
